<compile_context>
chip_gen: v7x
topology: tpu7x:2x2x1
jax: 0.10.0
libtpu: 0.0.40
codegen_flags: <defaults>
</compile_context>

<pallas_src>
import functools
from typing import NamedTuple

import jax
import jax.numpy as jnp
from jax.experimental import pallas as pl
from jax.experimental.pallas import tpu as pltpu


def _round_up(x, m):
    return (x + m - 1) // m * m


class PolicyMeta(NamedTuple):
    obs_dim: int
    state_dim: int
    ha: int          # actor hidden width
    hc: int          # critic hidden width
    act_dim: int
    obs_rows: int    # obs lane width / layer-1 weight rows (8-aligned)
    state_pad: int
    ha_pad: int
    hc_pad: int
    head_pad: int    # packed-output lane width (128-aligned)
    compute_bf16: bool


# ---------------------------------------------------------------------------
# Host-side parameter packing: one weight slab, one bias slab.
# ---------------------------------------------------------------------------
def pack_params(params, compute_dtype=jnp.float32):
    wr, br = params["wr"], params["br"]
    wa1, ba1 = params["wa1"], params["ba1"]
    wa2, ba2 = params["wa2"], params["ba2"]
    wc1, bc1 = params["wc1"], params["bc1"]
    wc2, bc2 = params["wc2"], params["bc2"]

    obs_dim, state_dim = wr.shape
    ha = wa1.shape[1]
    hc = wc1.shape[1]
    act = wa2.shape[1]

    obs_rows = _round_up(obs_dim, 8)                 # obs kept at natural lane width
    state_pad = _round_up(state_dim, 128)
    ha_pad = _round_up(ha, 128)
    hc_pad = _round_up(hc, 128)
    hid2_pad = ha_pad + hc_pad
    head_pad = _round_up(state_dim + act + 1, 128)   # packed [state | logits | v]

    w_rows = obs_rows + state_pad + hid2_pad
    w_cols = max(state_pad, hid2_pad, head_pad)

    w_slab = jnp.zeros((w_rows, w_cols), compute_dtype)
    # layer 1: representation Linear, rows [0, obs_rows)
    w_slab = w_slab.at[0:obs_dim, 0:state_dim].set(wr.astype(compute_dtype))
    # layer 2: fused actor|critic hidden Linear, rows [obs_rows, obs_rows+state_pad)
    r2 = obs_rows
    w_slab = w_slab.at[r2:r2 + state_dim, 0:ha].set(wa1.astype(compute_dtype))
    w_slab = w_slab.at[r2:r2 + state_dim, ha_pad:ha_pad + hc].set(wc1.astype(compute_dtype))
    # layer 3: fused heads; logits land at cols [state_dim, state_dim+act),
    # value at col state_dim+act -> merges with `state` (which is zero there).
    r3 = obs_rows + state_pad
    w_slab = w_slab.at[r3:r3 + ha, state_dim:state_dim + act].set(wa2.astype(compute_dtype))
    w_slab = w_slab.at[r3 + ha_pad:r3 + ha_pad + hc,
                       state_dim + act:state_dim + act + 1].set(wc2.astype(compute_dtype))

    b_cols = state_pad + hid2_pad + head_pad
    b_slab = jnp.zeros((1, b_cols), jnp.float32)
    b_slab = b_slab.at[:, 0:state_dim].set(br.astype(jnp.float32))
    c2 = state_pad
    b_slab = b_slab.at[:, c2:c2 + ha].set(ba1.astype(jnp.float32))
    b_slab = b_slab.at[:, c2 + ha_pad:c2 + ha_pad + hc].set(bc1.astype(jnp.float32))
    c3 = state_pad + hid2_pad
    b_slab = b_slab.at[:, c3 + state_dim:c3 + state_dim + act].set(ba2.astype(jnp.float32))
    b_slab = b_slab.at[:, c3 + state_dim + act:c3 + state_dim + act + 1].set(
        bc2.astype(jnp.float32))

    meta = PolicyMeta(obs_dim, state_dim, ha, hc, act,
                      obs_rows, state_pad, ha_pad, hc_pad, head_pad,
                      compute_bf16=(compute_dtype == jnp.bfloat16))
    return w_slab, b_slab, meta


# ---------------------------------------------------------------------------
# Fused kernel: 3 MXU dots, one lane-dense packed 128-lane output block.
# ---------------------------------------------------------------------------
def _policy_kernel(meta: PolicyMeta, obs_ref, w_ref, b_ref, out_ref):
    obs_rows = meta.obs_rows
    state_pad = meta.state_pad
    hid2_pad = meta.ha_pad + meta.hc_pad
    head_pad = meta.head_pad
    r2 = obs_rows
    r3 = obs_rows + state_pad
    c2 = state_pad
    c3 = state_pad + hid2_pad

    cdt = jnp.bfloat16 if meta.compute_bf16 else jnp.float32

    x = obs_ref[...].astype(cdt)                        # (TB, obs_rows)
    w1 = w_ref[0:obs_rows, 0:state_pad]                 # representation
    w2 = w_ref[r2:r2 + state_pad, 0:hid2_pad]           # fused actor|critic hidden
    w3 = w_ref[r3:r3 + hid2_pad, 0:head_pad]            # fused heads (shifted cols)
    b1 = b_ref[:, 0:state_pad]
    b2 = b_ref[:, c2:c2 + hid2_pad]
    b3 = b_ref[:, c3:c3 + head_pad]

    # representation: Linear + ReLU.  Padded lanes [state_dim, state_pad) are exact zeros.
    state = jnp.maximum(
        jnp.dot(x, w1, preferred_element_type=jnp.float32) + b1, 0.0)

    # fused hidden: actor in lanes [0, ha_pad), critic in [ha_pad, ha_pad+hc_pad)
    h = jnp.maximum(
        jnp.dot(state.astype(cdt), w2, preferred_element_type=jnp.float32) + b2, 0.0)

    # fused heads: logits at lanes [state_dim, state_dim+act), v at lane state_dim+act;
    # lanes [0, state_dim) are exact zeros -> merge with `state` via one VPU add.
    head = jnp.dot(h.astype(cdt), w3, preferred_element_type=jnp.float32) + b3

    if head_pad == state_pad:
        out_ref[...] = head + state
    else:  # head_pad > state_pad: still full-128-lane aligned stores
        out_ref[:, 0:state_pad] = head[:, 0:state_pad] + state
        out_ref[:, state_pad:head_pad] = head[:, state_pad:head_pad]


# ---------------------------------------------------------------------------
# Wrapper: batch-tiled grid, weights resident across tiles, packed output slab.
# ---------------------------------------------------------------------------
def _forward_impl(obs, w_slab, b_slab, meta: PolicyMeta, tile_b: int = 512):
    B = obs.shape[0]
    obs_lane = meta.obs_rows
    head_pad = meta.head_pad

    # batch tile: multiple of 8 sublanes, capped at tile_b
    tb = min(tile_b, _round_up(B, 8))
    b_pad = _round_up(B, tb)
    grid = (b_pad // tb,)

    if b_pad == B and obs_lane == meta.obs_dim:
        obs_p = obs.astype(jnp.float32)                 # fast path: no host-side copy
    else:
        obs_p = jnp.zeros((b_pad, obs_lane), jnp.float32)
        obs_p = obs_p.at[:B, :meta.obs_dim].set(obs.astype(jnp.float32))

    w_rows, w_cols = w_slab.shape
    b_cols = b_slab.shape[1]

    kernel = functools.partial(_policy_kernel, meta)

    packed = pl.pallas_call(
        kernel,
        out_shape=jax.ShapeDtypeStruct((b_pad, head_pad), jnp.float32),
        grid_spec=pltpu.PrefetchScalarGridSpec(
            num_scalar_prefetch=0,
            grid=grid,
            in_specs=[
                pl.BlockSpec((tb, obs_lane), lambda i: (i, 0)),    # obs tile
                pl.BlockSpec((w_rows, w_cols), lambda i: (0, 0)),  # weights: resident
                pl.BlockSpec((1, b_cols), lambda i: (0, 0)),       # biases:  resident
            ],
            out_specs=pl.BlockSpec((tb, head_pad), lambda i: (i, 0)),
        ),
        compiler_params=pltpu.CompilerParams(
            dimension_semantics=("parallel",),   # megacore-shard batch tiles on v7x
        ),
    )(obs_p, w_slab, b_slab)

    sd, ad = meta.state_dim, meta.act_dim
    state = packed[:B, 0:sd]
    logits = packed[:B, sd:sd + ad]
    v = packed[:B, sd + ad]
    outputs = {"state": state}
    # CategoricalDistribution.set_param(logits=...) -> return logits as dist params.
    return outputs, logits, v


actor_critic_forward = jax.jit(_forward_impl, static_argnames=("meta", "tile_b"))


# ---------------------------------------------------------------------------
# Deterministic synthetic parameter init (weights (in,out), biases (1,out)).
# ---------------------------------------------------------------------------
def init_params(key, obs_dim, state_dim, actor_hidden, critic_hidden, action_dim):
    ks = jax.random.split(key, 10)

    def lin(kw, kb, fan_in, fan_out):
        w = (jax.random.normal(kw, (fan_in, fan_out), jnp.float32)
             / jnp.sqrt(jnp.float32(fan_in)))
        b = 0.01 * jax.random.normal(kb, (1, fan_out), jnp.float32)
        return w, b

    p = {}
    p["wr"], p["br"] = lin(ks[0], ks[1], obs_dim, state_dim)
    p["wa1"], p["ba1"] = lin(ks[2], ks[3], state_dim, actor_hidden)
    p["wa2"], p["ba2"] = lin(ks[4], ks[5], actor_hidden, action_dim)
    p["wc1"], p["bc1"] = lin(ks[6], ks[7], state_dim, critic_hidden)
    p["wc2"], p["bc2"] = lin(ks[8], ks[9], critic_hidden, 1)
    return p


def _reference(obs, p):
    s = jnp.maximum(obs @ p["wr"] + p["br"], 0.0)
    ha = jnp.maximum(s @ p["wa1"] + p["ba1"], 0.0)
    lg = ha @ p["wa2"] + p["ba2"]
    hc = jnp.maximum(s @ p["wc1"] + p["bc1"], 0.0)
    vv = (hc @ p["wc2"] + p["bc2"])[:, 0]
    return s, lg, vv


if __name__ == "__main__":
    # Shapes consistent with the module: batch=2, obs_dim=16, state_dim=32,
    # actor_hidden_size=[32], critic_hidden_size=[32], action_space.n=6.
    B, OBS, STATE, HID, ACT = 2, 16, 32, 32, 6

    key = jax.random.PRNGKey(0)
    k_obs, k_par, k_big = jax.random.split(key, 3)
    obs = jax.random.normal(k_obs, (B, OBS), jnp.float32)
    params = init_params(k_par, OBS, STATE, HID, HID, ACT)

    # Pack once (weights stay packed/resident across calls), then run.
    # For v6e/v7x inference, pass compute_dtype=jnp.bfloat16 for the bf16 MXU path.
    w_slab, b_slab, meta = pack_params(params, compute_dtype=jnp.float32)

    outputs, logits, v = actor_critic_forward(obs, w_slab, b_slab, meta=meta)
    jax.block_until_ready((outputs["state"], logits, v))

    assert outputs["state"].shape == (B, STATE)
    assert logits.shape == (B, ACT)
    assert v.shape == (B,)

    s_r, lg_r, v_r = _reference(obs, params)
    assert jnp.allclose(outputs["state"], s_r, atol=1e-5)
    assert jnp.allclose(logits, lg_r, atol=1e-5)
    assert jnp.allclose(v, v_r, atol=1e-5)

    # Second check: a larger (ragged) batch that exercises the multi-tile grid path
    # and padded batch rows (tile_b=128 -> grid of 3 tiles).
    B2 = 260
    obs_big = jax.random.normal(k_big, (B2, OBS), jnp.float32)
    outputs2, logits2, v2 = actor_critic_forward(obs_big, w_slab, b_slab,
                                                 meta=meta, tile_b=128)
    jax.block_until_ready((outputs2["state"], logits2, v2))
    s_r2, lg_r2, v_r2 = _reference(obs_big, params)
    assert jnp.allclose(outputs2["state"], s_r2, atol=1e-5)
    assert jnp.allclose(logits2, lg_r2, atol=1e-5)
    assert jnp.allclose(v2, v_r2, atol=1e-5)

    print("KERNEL_OK")
</pallas_src>

<mosaic_0001>
module attributes {stable_mosaic.version = 11 : i64} {
  func.func @_policy_kernel(%arg0: i32, %arg1: memref<8x16xf32, #tpu.memory_space<vmem>>, %arg2: memref<400x256xf32, #tpu.memory_space<vmem>>, %arg3: memref<1x512xf32, #tpu.memory_space<vmem>>, %arg4: memref<8x128xf32, #tpu.memory_space<vmem>>) attributes {dimension_semantics = [#tpu.dimension_semantics<parallel>], iteration_bounds = array<i64: 1>, scalar_prefetch = 0 : i64, scratch_operands = 0 : i64, tpu.core_type = #tpu.core_type<tc>, window_params = [{transform_indices = @transform_0, window_bounds = array<i64: 8, 16>}, {pipeline_mode = #tpu.pipeline_mode<synchronous>, transform_indices = @transform_1, window_bounds = array<i64: 400, 256>}, {pipeline_mode = #tpu.pipeline_mode<synchronous>, transform_indices = @transform_2, window_bounds = array<i64: 1, 512>}, {transform_indices = @transform_3, window_bounds = array<i64: 8, 128>}]} {
    %c0 = arith.constant 0 : index
    %c0_0 = arith.constant 0 : index
    %0 = vector.load %arg1[%c0, %c0_0] : memref<8x16xf32, #tpu.memory_space<vmem>>, vector<8x16xf32>
    %c0_1 = arith.constant 0 : index
    %c0_2 = arith.constant 0 : index
    %1 = vector.load %arg2[%c0_1, %c0_2] : memref<400x256xf32, #tpu.memory_space<vmem>>, vector<16x128xf32>
    %c16 = arith.constant 16 : index
    %c0_3 = arith.constant 0 : index
    %2 = vector.load %arg2[%c16, %c0_3] : memref<400x256xf32, #tpu.memory_space<vmem>>, vector<128x256xf32>
    %c144 = arith.constant 144 : index
    %c0_4 = arith.constant 0 : index
    %3 = vector.load %arg2[%c144, %c0_4] : memref<400x256xf32, #tpu.memory_space<vmem>>, vector<256x128xf32>
    %c0_5 = arith.constant 0 : index
    %c0_6 = arith.constant 0 : index
    %4 = vector.load %arg3[%c0_5, %c0_6] : memref<1x512xf32, #tpu.memory_space<vmem>>, vector<1x128xf32>
    %c0_7 = arith.constant 0 : index
    %c128 = arith.constant 128 : index
    %5 = vector.load %arg3[%c0_7, %c128] : memref<1x512xf32, #tpu.memory_space<vmem>>, vector<1x256xf32>
    %c0_8 = arith.constant 0 : index
    %c384 = arith.constant 384 : index
    %6 = vector.load %arg3[%c0_8, %c384] : memref<1x512xf32, #tpu.memory_space<vmem>>, vector<1x128xf32>
    %cst = arith.constant dense<0.000000e+00> : vector<8x128xf32>
    %7 = tpu.matmul %0, %1, %cst {dimension_numbers = #tpu.dot_dimension_numbers<[1], [0], [0], [1], [0, 0, 1, 1], [], []>} : vector<8x16xf32>, vector<16x128xf32>, vector<8x128xf32> -> vector<8x128xf32>
    %8 = vector.broadcast %4 : vector<1x128xf32> to vector<8x128xf32>
    %9 = arith.addf %7, %8 : vector<8x128xf32>
    %cst_9 = arith.constant 0.000000e+00 : f32
    %10 = vector.broadcast %cst_9 : f32 to vector<8x128xf32>
    %11 = arith.maximumf %9, %10 : vector<8x128xf32>
    %cst_10 = arith.constant dense<0.000000e+00> : vector<8x256xf32>
    %12 = tpu.matmul %11, %2, %cst_10 {dimension_numbers = #tpu.dot_dimension_numbers<[1], [0], [0], [1], [0, 0, 1, 1], [], []>} : vector<8x128xf32>, vector<128x256xf32>, vector<8x256xf32> -> vector<8x256xf32>
    %13 = vector.broadcast %5 : vector<1x256xf32> to vector<8x256xf32>
    %14 = arith.addf %12, %13 : vector<8x256xf32>
    %cst_11 = arith.constant 0.000000e+00 : f32
    %15 = vector.broadcast %cst_11 : f32 to vector<8x256xf32>
    %16 = arith.maximumf %14, %15 : vector<8x256xf32>
    %cst_12 = arith.constant dense<0.000000e+00> : vector<8x128xf32>
    %17 = tpu.matmul %16, %3, %cst_12 {dimension_numbers = #tpu.dot_dimension_numbers<[1], [0], [0], [1], [0, 0, 1, 1], [], []>} : vector<8x256xf32>, vector<256x128xf32>, vector<8x128xf32> -> vector<8x128xf32>
    %18 = vector.broadcast %6 : vector<1x128xf32> to vector<8x128xf32>
    %19 = arith.addf %17, %18 : vector<8x128xf32>
    %20 = arith.addf %19, %11 : vector<8x128xf32>
    %c0_13 = arith.constant 0 : index
    %c0_14 = arith.constant 0 : index
    %21 = vector.load %arg4[%c0_13, %c0_14] : memref<8x128xf32, #tpu.memory_space<vmem>>, vector<8x128xf32>
    tpu.vector_store %arg4[%c0_13, %c0_14], %20 {strides = array<i32>} : memref<8x128xf32, #tpu.memory_space<vmem>>, vector<8x128xf32>,
    return
  }
  func.func @transform_0(%arg0: i32) -> (i32, i32) {
    %c0_i32 = arith.constant 0 : i32
    %c0_i32_0 = arith.constant 0 : i32
    return %arg0, %c0_i32 : i32, i32
  }
  func.func @transform_1(%arg0: i32) -> (i32, i32) {
    %c0_i32 = arith.constant 0 : i32
    %c0_i32_0 = arith.constant 0 : i32
    %c0_i32_1 = arith.constant 0 : i32
    return %c0_i32, %c0_i32_0 : i32, i32
  }
  func.func @transform_2(%arg0: i32) -> (i32, i32) {
    %c0_i32 = arith.constant 0 : i32
    %c0_i32_0 = arith.constant 0 : i32
    %c0_i32_1 = arith.constant 0 : i32
    return %c0_i32, %c0_i32_0 : i32, i32
  }
  func.func @transform_3(%arg0: i32) -> (i32, i32) {
    %c0_i32 = arith.constant 0 : i32
    %c0_i32_0 = arith.constant 0 : i32
    return %arg0, %c0_i32 : i32, i32
  }
}

</mosaic_0001>

<bundles_post_ra>
// kernel: _forward_impl.1
= control target key start
LH: loop header
LB: loop body
LE: loop exit
PB: predicated region body
PF: predicated region fallthrough
CT: control target
= control target key end

     0   :  { %8 = vsyncpa [#allocation3], 0  ;;  %s491_s12 = smov [#allocation2]   ;;  %s544_s0 = inlined_call_operand.vmem [shape: f32[8,16], index: 0, kind: input, shape index: {}]   ;;  %s545_s1 = inlined_call_operand.hbm [shape: f32[400,256], index: 1, kind: input, shape index: {}]   ;;  %s546_s2 = inlined_call_operand.vmem [shape: f32[1,512], index: 2, kind: input, shape index: {}]   ;;  %s547_s3 = inlined_call_operand.vmem [shape: f32[8,128], index: 3, kind: output, shape index: {}]  }
   0x1   :  { %s16_s13 = sshll.u32 %s491_s12, 4  ;;  %s467_s16 = scalar_lea.hbm %s545_s1, 12800  ;;  %s17_s13 = int_to_ptr.vmem [resolvable:$true] %s16_s13 }
   0x2   :  { %p468_p0 = scmp.ne.s32.totalorder %s545_s1, %s467_s16  ;;  %p471_p1 = scmp.lt.u32.totalorder %s467_s16, %s545_s1 }
   0x4   :  { %p473_p2 = pnand %p471_p1, %p468_p0 }
   0x6   :  { %476 = shalt.err (!%p473_p2)
}
   0x7   :  { %s477_s21 = scalar_lea.vmem %s17_s13, 12800  ;;  %p482_p4 = scmp.lt.s32.totalorder %s17_s13, %s17_s13 }
   0x8   :  { %p478_p3 = scmp.ne.s32.totalorder %s17_s13, %s477_s21  ;;  %p483_p5 = scmp.lt.s32.totalorder %s477_s21, %s477_s21 }
   0xa   :  { %p484_p6 = por %p483_p5, %p482_p4 }
   0xc   :  { %p485_p7 = pnand %p484_p6, %p478_p3 }
   0xe   :  { %488 = shalt.err (!%p485_p7)
}
   0xf   :  { %s492_s22 = smov 256   ;;  %s493_s23 = smov 16  }
  0x10   :  { %22 = dma.hbm_to_vmem [thread:$0]  %s545_s1, 12800, %s17_s13, [#allocation3], %s492_s22, %s492_s22, %s493_s23  }
  0x11   :  { %489 = dma.done.wait [#allocation3], 12800  }
  0x12   :  { %490 = vsyncadd [#allocation3], 4294954496  ;;  %v494_v0 = vmov 0.0|0.0   ;;  %vm495_vm0 = vmmov 0   ;;  %v496_v1 = vmov 0.0   ;;  %v29_v2 = vld [vmem:[#allocation2] sm:$0xff] }
  0x13   :  { %394 = vmatprep.subr.bf16.mxu0 %v494_v0  ;;  %391 = vmatprep.mubr.msk.f32.mxu0 %vm495_vm0, %v496_v1  ;;  %v30_v3 = vld [vmem:[#allocation2 + $0x10] sm:$0xff]  ;;  %v28_v5 = vld [vmem:[%s544_s0] sm:$0xff]  ;;  %v32_v6 = vld [vmem:[#allocation2 + $0x28] sm:$0xff]  ;;  %vm104_vm1 = vcmask 130048  }
  0x14   :  { %254 = vmatprep.mubr.f32.mxu1 %v496_v1  ;;  %v395_v4 = vpack.c.bf16 %v30_v3, %v29_v2  ;;  %v34_v7 = vld [vmem:[#allocation2 + $0x38] sm:$0xff]  ;;  %v31_v8 = vld [vmem:[#allocation2 + $0x20] sm:$0xff]  ;;  %v33_v10 = vld [vmem:[#allocation2 + $0x30] sm:$0xff] }
  0x15   :  { %v397_v9 = vpack.c.bf16 %v34_v7, %v32_v6  ;;  %v36_v11 = vld [vmem:[#allocation2 + $0x48] sm:$0xff]  ;;  %v38_v12 = vld [vmem:[#allocation2 + $0x58] sm:$0xff]  ;;  %v399_v13 = vpack.c.bf16 %v33_v10, %v31_v8  ;;  %v35_v15 = vld [vmem:[#allocation2 + $0x40] sm:$0xff] }
  0x16   :  { %396 = vmatpush3.bf16.msra.mxu0 %v395_v4  ;;  %v401_v14 = vpack.c.bf16 %v38_v12, %v36_v11  ;;  %v37_v16 = vld [vmem:[#allocation2 + $0x50] sm:$0xff]  ;;  %v40_v17 = vld [vmem:[#allocation2 + $0x68] sm:$0xff]  ;;  %v42_v18 = vld [vmem:[#allocation2 + $0x78] sm:$0xff] }
  0x17   :  { %398 = vmatprep.subr.bf16.mxu1 %v397_v9  ;;  %v403_v19 = vpack.c.bf16 %v37_v16, %v35_v15  ;;  %v405_v20 = vpack.c.bf16 %v42_v18, %v40_v17  ;;  %v39_v21 = vld [vmem:[#allocation2 + $0x60] sm:$0xff]  ;;  %v41_v22 = vld [vmem:[#allocation2 + $0x70] sm:$0xff]  ;;  %v44_v23 = vld [vmem:[#allocation2 + $0x88] sm:$0xff] }
  0x18   :  { %400 = vmatpush1.bf16.msra.mxu1 %v399_v13  ;;  %v46_v24 = vld [vmem:[#allocation2 + $0x98] sm:$0xff]  ;;  %v407_v25 = vpack.c.bf16 %v41_v22, %v39_v21  ;;  %v43_v27 = vld [vmem:[#allocation2 + $0x80] sm:$0xff]  ;;  %v45_v28 = vld [vmem:[#allocation2 + $0x90] sm:$0xff] }
  0x19   :  { %392 = vmatmul.mubr.msk.f32.vlgmr.msra.gmra.mrb[0].mxu0 %vm104_vm1, %v28_v5  ;;  %402 = vmatprep.subr.bf16.mxu1 %v401_v14  ;;  %v409_v26 = vpack.c.bf16 %v46_v24, %v44_v23  ;;  %v48_v29 = vld [vmem:[#allocation2 + $0xa8] sm:$0xff]  ;;  %v50_v30 = vld [vmem:[#allocation2 + $0xb8] sm:$0xff]  ;;  %v411_v31 = vpack.c.bf16 %v45_v28, %v43_v27  ;;  %v47_v33 = vld [vmem:[#allocation2 + $0xa0] sm:$0xff] }
  0x1a   :  { %v413_v32 = vpack.c.bf16 %v50_v30, %v48_v29  ;;  %v49_v34 = vld [vmem:[#allocation2 + $0xb0] sm:$0xff]  ;;  %v52_v35 = vld [vmem:[#allocation2 + $0xc8] sm:$0xff]  ;;  %v54_v36 = vld [vmem:[#allocation2 + $0xd8] sm:$0xff] }
  0x1b   :  { %v415_v37 = vpack.c.bf16 %v49_v34, %v47_v33  ;;  %v417_v38 = vpack.c.bf16 %v54_v36, %v52_v35  ;;  %v51_v39 = vld [vmem:[#allocation2 + $0xc0] sm:$0xff]  ;;  %v53_v40 = vld [vmem:[#allocation2 + $0xd0] sm:$0xff]  ;;  %v56_v41 = vld [vmem:[#allocation2 + $0xe8] sm:$0xff] }
  0x1c   :  { %404 = vmatpush1.bf16.msra.mxu1 %v403_v19  ;;  %v58_v42 = vld [vmem:[#allocation2 + $0xf8] sm:$0xff]  ;;  %v419_v43 = vpack.c.bf16 %v53_v40, %v51_v39  ;;  %v55_v45 = vld [vmem:[#allocation2 + $0xe0] sm:$0xff]  ;;  %v57_v46 = vld [vmem:[#allocation2 + $0xf0] sm:$0xff] }
  0x1d   :  { %406 = vmatprep.subr.bf16.mxu1 %v405_v20  ;;  %v421_v44 = vpack.c.bf16 %v58_v42, %v56_v41  ;;  %v423_v47 = vpack.c.bf16 %v57_v46, %v55_v45  ;;  %v60_v48 = vld [vmem:[#allocation2 + $0x108] sm:$0xff]  ;;  %v62_v49 = vld [vmem:[#allocation2 + $0x118] sm:$0xff]  ;;  %v59_v51 = vld [vmem:[#allocation2 + $0x100] sm:$0xff] }
  0x1e   :  { %v425_v50 = vpack.c.bf16 %v62_v49, %v60_v48  ;;  %v61_v52 = vld [vmem:[#allocation2 + $0x110] sm:$0xff]  ;;  %v79_v54 = vld [vmem:[#allocation2 + $0x220] sm:$0xff] }
  0x1f   :  { %v427_v53 = vpack.c.bf16 %v61_v52, %v59_v51  ;;  %v80_v55 = vld [vmem:[#allocation2 + $0x230] sm:$0xff]  ;;  %v63_v56 = vld [vmem:[#allocation2 + $0x120] sm:$0xff] }
  0x20   :  { %408 = vmatpush1.bf16.msra.mxu1 %v407_v25  ;;  %v429_v57 = vpack.c.bf16 %v80_v55, %v79_v54  ;;  %v64_v58 = vld [vmem:[#allocation2 + $0x130] sm:$0xff]  ;;  %v81_v59 = vld [vmem:[#allocation2 + $0x240] sm:$0xff] }
  0x21   :  { %410 = vmatprep.subr.bf16.mxu1 %v409_v26  ;;  %v82_v60 = vld [vmem:[#allocation2 + $0x250] sm:$0xff]  ;;  %v431_v61 = vpack.c.bf16 %v64_v58, %v63_v56  ;;  %v65_v63 = vld [vmem:[#allocation2 + $0x140] sm:$0xff] }
  0x22   :  { %v433_v62 = vpack.c.bf16 %v82_v60, %v81_v59  ;;  %v66_v0 = vld [vmem:[#allocation2 + $0x150] sm:$0xff]  ;;  %v83_v1 = vld [vmem:[#allocation2 + $0x260] sm:$0xff]  ;;  %430 = vmatprep.subr.bf16.mxu0 %v429_v57 }
  0x23   :  { %v84_v2 = vld [vmem:[#allocation2 + $0x270] sm:$0xff]  ;;  %432 = vmatpush3.bf16.msra.mxu0 %v431_v61  ;;  %v435_v3 = vpack.c.bf16 %v66_v0, %v65_v63  ;;  %v67_v5 = vld [vmem:[#allocation2 + $0x160] sm:$0xff] }
  0x24   :  { %412 = vmatpush1.bf16.msra.mxu1 %v411_v31  ;;  %434 = vmatprep.subr.bf16.mxu0 %v433_v62  ;;  %v437_v4 = vpack.c.bf16 %v84_v2, %v83_v1  ;;  %v68_v6 = vld [vmem:[#allocation2 + $0x170] sm:$0xff]  ;;  %v85_v7 = vld [vmem:[#allocation2 + $0x280] sm:$0xff] }
  0x25   :  { %414 = vmatprep.subr.bf16.mxu1 %v413_v32  ;;  %v86_v8 = vld [vmem:[#allocation2 + $0x290] sm:$0xff]  ;;  %v439_v9 = vpack.c.bf16 %v68_v6, %v67_v5  ;;  %v69_v11 = vld [vmem:[#allocation2 + $0x180] sm:$0xff] }
  0x26   :  { %v441_v10 = vpack.c.bf16 %v86_v8, %v85_v7  ;;  %v70_v12 = vld [vmem:[#allocation2 + $0x190] sm:$0xff]  ;;  %v87_v13 = vld [vmem:[#allocation2 + $0x2a0] sm:$0xff] }
  0x27   :  { %436 = vmatpush3.bf16.msra.mxu0 %v435_v3  ;;  %v88_v14 = vld [vmem:[#allocation2 + $0x2b0] sm:$0xff]  ;;  %v443_v15 = vpack.c.bf16 %v70_v12, %v69_v11  ;;  %v71_v17 = vld [vmem:[#allocation2 + $0x1a0] sm:$0xff] }
  0x28   :  { %416 = vmatpush1.bf16.msra.mxu1 %v415_v37  ;;  %438 = vmatprep.subr.bf16.mxu0 %v437_v4  ;;  %v445_v16 = vpack.c.bf16 %v88_v14, %v87_v13  ;;  %v72_v18 = vld [vmem:[#allocation2 + $0x1b0] sm:$0xff]  ;;  %v89_v19 = vld [vmem:[#allocation2 + $0x2c0] sm:$0xff] }
  0x29   :  { %418 = vmatprep.subr.bf16.mxu1 %v417_v38  ;;  %v90_v20 = vld [vmem:[#allocation2 + $0x2d0] sm:$0xff]  ;;  %v447_v21 = vpack.c.bf16 %v72_v18, %v71_v17  ;;  %v73_v23 = vld [vmem:[#allocation2 + $0x1c0] sm:$0xff] }
  0x2a   :  { %v449_v22 = vpack.c.bf16 %v90_v20, %v89_v19  ;;  %v74_v24 = vld [vmem:[#allocation2 + $0x1d0] sm:$0xff]  ;;  %v91_v25 = vld [vmem:[#allocation2 + $0x2e0] sm:$0xff] }
  0x2b   :  { %440 = vmatpush3.bf16.msra.mxu0 %v439_v9  ;;  %v92_v26 = vld [vmem:[#allocation2 + $0x2f0] sm:$0xff]  ;;  %v451_v27 = vpack.c.bf16 %v74_v24, %v73_v23  ;;  %v346_v29 = vld [vmem:[%s546_s2] ss:$0 sm:$0xff]  ;;  %v96_v46 = vld [vmem:[%s546_s2 + $0x1] sm:$0x3] }
  0x2c   :  { %420 = vmatpush1.bf16.msra.mxu1 %v419_v43  ;;  %442 = vmatprep.subr.bf16.mxu0 %v441_v10  ;;  %v453_v28 = vpack.c.bf16 %v92_v26, %v91_v25  ;;  %v75_v34 = vld [vmem:[#allocation2 + $0x1e0] sm:$0xff]  ;;  %v76_v35 = vld [vmem:[#allocation2 + $0x1f0] sm:$0xff]  ;;  %v180_v43 = vlaneseq }
  0x2d   :  { %422 = vmatprep.subr.bf16.mxu1 %v421_v44  ;;  %v455_v36 = vpack.c.bf16 %v76_v35, %v75_v34  ;;  %v93_v37 = vld [vmem:[#allocation2 + $0x300] sm:$0xff]  ;;  %v94_v38 = vld [vmem:[#allocation2 + $0x310] sm:$0xff] }
  0x2e   :  { %v457_v39 = vpack.c.bf16 %v94_v38, %v93_v37  ;;  %v77_v40 = vld [vmem:[#allocation2 + $0x200] sm:$0xff]  ;;  %v78_v41 = vld [vmem:[#allocation2 + $0x210] sm:$0xff]  ;;  %v181_v44 = vshrl.u32 %v180_v43, 7 }
  0x2f   :  { %444 = vmatpush3.bf16.msra.mxu0 %v443_v15  ;;  %v459_v42 = vpack.c.bf16 %v78_v41, %v77_v40  ;;  %v348_v57 = vld [vmem:[%s546_s2 + $0x3] ss:$0 sm:$0xff] }
  0x30   :  { %424 = vmatpush1.bf16.msra.mxu1 %v423_v47  ;;  %446 = vmatprep.subr.bf16.mxu0 %v445_v16  ;;  %v182_v45 = vsub.s32 0, %v181_v44  ;;  %v186_v47 = vsub.s32 1, %v181_v44 }
  0x31   :  { %426 = vmatprep.subr.bf16.mxu1 %v425_v50 }
  0x32   :  { %v183_v48 = vrot.slane %v96_v46, %v182_v45  ;;  %v187_v49 = vrot.slane %v96_v46, %v186_v47 }
  0x33   :  { %448 = vmatpush3.bf16.msra.mxu0 %v447_v21 }
  0x34   :  { %428 = vmatpush1.bf16.msra.mxu1 %v427_v53  ;;  %450 = vmatprep.subr.bf16.mxu0 %v449_v22 }
  0x37   :  { %452 = vmatpush3.bf16.msra.mxu0 %v451_v27 }
  0x38   :  { %454 = vmatprep.subr.bf16.mxu0 %v453_v28 }
  0x3b   :  { %456 = vmatpush3.bf16.msra.mxu0 %v455_v36 }
  0x3c   :  { %458 = vmatprep.subr.bf16.mxu0 %v457_v39 }
  0x3f   :  { %460 = vmatpush3.bf16.msra.mxu0 %v459_v42 }
  0xec   :  { %v174_v30 = vpop.f32.mrb[0].mxu0 }
  0xed   :  { %v175_v31 = vadd.f32 %v346_v29, %v174_v30  ;;  %v393_v32 = vpop.f32.mrb[1].mxu0 }
  0xef   :  { %v178_v33 = vmax.f32 %v175_v31, 0.0 }
  0xf1   :  { %255 = vmatmul.mubr.f32.vlgmr.msra.gmra.mrb[0].mxu1 %v178_v33 }
 0x1c4   :  { %v256_v50 = vpop.f32.mrb[0].mxu1 }
 0x1c5   :  { %v257_v51 = vadd.f32 %v256_v50, %v183_v48  ;;  %v258_v52 = vpop.f32.mrb[1].mxu1 }
 0x1c6   :  { %v259_v53 = vadd.f32 %v258_v52, %v187_v49 }
 0x1c7   :  { %v261_v55 = vmax.f32 %v257_v51, 0.0 }
 0x1c8   :  { %v262_v54 = vmax.f32 %v259_v53, 0.0 }
 0x1ca   :  { %333 = vmatprep.mubr.f32.mxu0 %v262_v54 }
 0x1cb   :  { %334 = vmatmul.mubr.f32.vlgmr.msra.gmra.mrb[2].mxu0 %v261_v55 }
 0x29e   :  { %v384_v56 = vpop.f32.mrb[2].mxu0 }
 0x29f   :  { %v385_v58 = vpop.f32.mrb[3].mxu0 }
 0x2a0   :  { %v386_v59 = vadd.f32 %v385_v58, %v384_v56 }
 0x2a2   :  { %v336_v60 = vadd.f32 %v386_v59, %v348_v57 }
 0x2a4   :  { %v339_v61 = vadd.f32 %v336_v60, %v178_v33 }
 0x2a6   :  { %340 = vst [vmem:[%s547_s3] sm:$0xff] %v339_v61 }
 0x2a7   :  { %345 = vsyncpa [#allocation3], 1 }

</bundles_post_ra>
